<compile_context>
chip_gen: v6e
topology: v6e:2x2x1
jax: 0.10.0
libtpu: 0.0.40
codegen_flags: <defaults>
</compile_context>

<pallas_src>
import functools

import jax
import jax.numpy as jnp
from jax.experimental import pallas as pl
from jax.experimental.pallas import tpu as pltpu

GAMMA = 1.5
ALPHA = 0.25
LANES = 128
MAX_TILE_ROWS = 2048      # 2048 x 128 f32 = 1 MiB input block


def _round_up(a, b):
    return (a + b - 1) // b * b


def _num_tensorcores():
    """Best-effort TensorCores per chip: 2 on v7x-class parts, else 1."""
    try:
        info = pltpu.get_tpu_info()
        for attr in ("num_cores", "core_count", "num_tensorcores"):
            v = getattr(info, attr, None)
            if isinstance(v, int) and v > 0:
                return v
    except Exception:
        pass
    try:
        kind = jax.devices()[0].device_kind.lower()
        if any(tag in kind for tag in ("v7", "7x", "v4", "v5p")):
            return 2
    except Exception:
        pass
    return 1


def _sublane_granularity(dtype):
    # 8 sublanes for 4-byte dtypes, 16 for 2-byte, 32 for 1-byte.
    return max(8, 8 * (4 // max(1, jnp.dtype(dtype).itemsize)))


def _qfocal_kernel(pred_ref, true_ref, out_ref, acc_ref, *,
                   n_valid, tiles_per_p, tile_rows, gamma, alpha):
    p = pl.program_id(0)          # parallel partial-sum axis (one per TC)
    j = pl.program_id(1)          # sequential reduction axis
    t = p * tiles_per_p + j       # logical tile index over the flat input

    @pl.when(j == 0)
    def _():
        acc_ref[...] = jnp.zeros_like(acc_ref)

    x = pred_ref[...].astype(jnp.float32)   # logits
    z = true_ref[...].astype(jnp.float32)   # targets

    # BCEWithLogitsLoss(reduction='none'), numerically stable, sharing
    # e = exp(-|x|) between the BCE term and the sigmoid.
    e = jnp.exp(-jnp.abs(x))
    bce = jnp.maximum(x, 0.0) - x * z + jnp.log1p(e)

    # sigmoid(x): approx EUP reciprocal + one Newton step (~f32 accuracy,
    # cheaper on the VALU than a full-precision divide).
    yp = 1.0 + e
    r0 = pl.reciprocal(yp, approx=True)
    r = r0 * (2.0 - yp * r0)
    pred_prob = jnp.where(x >= 0.0, r, e * r)          # == sigmoid(x)

    # Quality-focal modulation; alpha constants folded (2 VALU ops).
    alpha_factor = (1.0 - alpha) + z * (2.0 * alpha - 1.0)
    d = jnp.abs(z - pred_prob)
    if gamma == 1.5:
        modulating = d * jnp.sqrt(d)                   # avoid pow -> exp(g*log)
    elif gamma == 2.0:
        modulating = d * d
    elif gamma == 1.0:
        modulating = d
    else:
        modulating = d ** gamma
    loss = bce * alpha_factor * modulating

    tile_elems = tile_rows * LANES
    tile_start = t * tile_elems
    tile_is_full = tile_start + tile_elems <= n_valid

    # Fast path: interior tiles need no padding mask.
    @pl.when(tile_is_full)
    def _():
        acc_ref[...] += loss.reshape(-1, 8, LANES).sum(axis=0)

    # Tail / clamped out-of-range tiles: mask block-padded elements.  Keep the
    # select form (NOT loss * mask) so NaN/Inf computed on uninitialized
    # padding cannot propagate into the accumulator.
    @pl.when(jnp.logical_not(tile_is_full))
    def _():
        tm, tc = loss.shape
        row = jax.lax.broadcasted_iota(jnp.int32, (tm, tc), 0)
        col = jax.lax.broadcasted_iota(jnp.int32, (tm, tc), 1)
        flat_idx = tile_start + row * tc + col
        masked = jnp.where(flat_idx < n_valid, loss, 0.0)
        acc_ref[...] += masked.reshape(-1, 8, LANES).sum(axis=0)

    @pl.when(j == pl.num_programs(1) - 1)
    def _():
        out_ref[...] = acc_ref[...]      # lane-dense (8, 128) partial sums


def _qfocal_elementwise(x, z, gamma, alpha):
    """Plain-JAX per-element QFocal loss (used for the <128-element tail)."""
    x = x.astype(jnp.float32)
    z = z.astype(jnp.float32)
    bce = jnp.maximum(x, 0.0) - x * z + jnp.log1p(jnp.exp(-jnp.abs(x)))
    p = jax.nn.sigmoid(x)
    alpha_factor = (1.0 - alpha) + z * (2.0 * alpha - 1.0)
    d = jnp.abs(z - p)
    mod = d * jnp.sqrt(d) if gamma == 1.5 else d ** gamma
    return bce * alpha_factor * mod


def qfocal_loss(pred, true, gamma=GAMMA, alpha=ALPHA, reduction="mean"):
    """QFocalLoss(nn.BCEWithLogitsLoss()) forward. Returns scalar loss."""
    assert pred.shape == true.shape
    n = int(pred.size)

    pred_f = pred.reshape(-1)
    true_f = true.reshape(-1)

    aligned = (n // LANES) * LANES
    rows = aligned // LANES

    # <128 leftover elements: negligible, plain-JAX (avoids any padded copy).
    if aligned < n:
        rem_sum = jnp.sum(
            _qfocal_elementwise(pred_f[aligned:], true_f[aligned:], gamma, alpha))
    else:
        rem_sum = jnp.float32(0.0)

    if rows == 0:
        total = rem_sum
    else:
        # Lane-aligned prefix: zero-copy reshape when n is already aligned.
        pred_2d = pred_f[:aligned].reshape(rows, LANES)
        true_2d = true_f[:aligned].reshape(rows, LANES)

        row_gran = max(_sublane_granularity(pred.dtype),
                       _sublane_granularity(true.dtype))
        tile_rows = min(MAX_TILE_ROWS, _round_up(rows, row_gran))
        assert _round_up(rows, tile_rows) * LANES < 2 ** 31, "int32 index overflow"
        n_tiles = pl.cdiv(rows, tile_rows)
        num_p = max(1, min(_num_tensorcores(), n_tiles))
        tiles_per_p = pl.cdiv(n_tiles, num_p)

        def in_map(p, j):
            t = p * tiles_per_p + j
            # Programs past the last real tile are clamped onto it; their
            # contribution is fully masked in-kernel (flat_idx >= n_valid).
            return (jnp.minimum(t, n_tiles - 1), 0)

        kernel = functools.partial(
            _qfocal_kernel, n_valid=aligned, tiles_per_p=tiles_per_p,
            tile_rows=tile_rows, gamma=gamma, alpha=alpha)

        bytes_in = aligned * (pred.dtype.itemsize + true.dtype.itemsize)
        cost = pl.CostEstimate(flops=20 * aligned, transcendentals=3 * aligned,
                               bytes_accessed=bytes_in + num_p * 8 * LANES * 4)

        partials = pl.pallas_call(
            kernel,
            out_shape=jax.ShapeDtypeStruct((num_p * 8, LANES), jnp.float32),
            grid_spec=pltpu.PrefetchScalarGridSpec(
                num_scalar_prefetch=0,
                grid=(num_p, tiles_per_p),
                in_specs=[pl.BlockSpec((tile_rows, LANES), in_map),
                          pl.BlockSpec((tile_rows, LANES), in_map)],
                out_specs=pl.BlockSpec((8, LANES), lambda p, j: (p, 0)),
                scratch_shapes=[pltpu.VMEM((8, LANES), jnp.float32)],
            ),
            compiler_params=pltpu.CompilerParams(
                # TODO(synk): on v7x verify in the trace that the leading axis is
                # really split across both TensorCores; if not, switch it to
                # pltpu.CORE_PARALLEL.
                dimension_semantics=("parallel", "arbitrary"),
            ),
            cost_estimate=cost,
        )(pred_2d, true_2d)

        # Final tiny cross-lane reduce of (num_p*8, 128) partials in XLA.
        total = jnp.sum(partials) + rem_sum

    if reduction == "mean":
        return total / n
    if reduction == "sum":
        return total
    # TODO(synk): reduction='none' (per-element loss tensor output) not implemented.
    raise NotImplementedError("only 'mean' and 'sum' reductions are supported")


def _qfocal_loss_ref(pred, true, gamma=GAMMA, alpha=ALPHA):
    x = pred.astype(jnp.float32)
    z = true.astype(jnp.float32)
    bce = jnp.maximum(x, 0.0) - x * z + jnp.log1p(jnp.exp(-jnp.abs(x)))
    p = jax.nn.sigmoid(x)
    loss = bce * (z * alpha + (1 - z) * (1 - alpha)) * jnp.abs(z - p) ** gamma
    return jnp.mean(loss)


if __name__ == "__main__":
    key = jax.random.PRNGKey(0)
    k1, k2, k3, k4, k5, k6 = jax.random.split(key, 6)

    # NCHW YOLO-style objectness/class logits (lane-aligned n).
    pred = jax.random.normal(k1, (2, 4, 16, 16), dtype=jnp.float32)
    true = (jax.random.uniform(k2, (2, 4, 16, 16)) > 0.7).astype(jnp.float32)
    out = jax.block_until_ready(qfocal_loss(pred, true))
    ref = _qfocal_loss_ref(pred, true)
    assert jnp.allclose(out, ref, rtol=1e-4, atol=1e-6), (out, ref)

    # Awkward non-lane-aligned shape: aligned-prefix kernel + JAX remainder.
    pred2 = jax.random.normal(k3, (2, 3, 7, 19), dtype=jnp.float32)
    true2 = (jax.random.uniform(k4, (2, 3, 7, 19)) > 0.7).astype(jnp.float32)
    out2 = jax.block_until_ready(qfocal_loss(pred2, true2))
    ref2 = _qfocal_loss_ref(pred2, true2)
    assert jnp.allclose(out2, ref2, rtol=1e-4, atol=1e-6), (out2, ref2)

    # bf16 logits / bf16 {0,1} targets accepted directly (halves HBM traffic
    # on bandwidth-bound v5e/v6e); math stays f32 in-register.
    pred3 = jax.random.normal(k5, (2, 4, 16, 16), dtype=jnp.bfloat16)
    true3 = (jax.random.uniform(k6, (2, 4, 16, 16)) > 0.7).astype(jnp.bfloat16)
    out3 = jax.block_until_ready(qfocal_loss(pred3, true3))
    ref3 = _qfocal_loss_ref(pred3, true3)
    assert jnp.allclose(out3, ref3, rtol=1e-4, atol=1e-6), (out3, ref3)

    print("KERNEL_OK")
</pallas_src>

<mosaic_0001>
module attributes {stable_mosaic.version = 11 : i64} {
  func.func @_qfocal_kernel(%arg0: i32, %arg1: i32, %arg2: memref<16x128xf32, #tpu.memory_space<vmem>>, %arg3: memref<16x128xf32, #tpu.memory_space<vmem>>, %arg4: memref<8x128xf32, #tpu.memory_space<vmem>>, %arg5: memref<8x128xf32, #tpu.memory_space<vmem>>) attributes {dimension_semantics = [#tpu.dimension_semantics<parallel>, #tpu.dimension_semantics<arbitrary>], iteration_bounds = array<i64: 1, 1>, scalar_prefetch = 0 : i64, scratch_operands = 1 : i64, tpu.core_type = #tpu.core_type<tc>, window_params = [{transform_indices = @transform_0, window_bounds = array<i64: 16, 128>}, {transform_indices = @transform_1, window_bounds = array<i64: 16, 128>}, {transform_indices = @transform_2, window_bounds = array<i64: 8, 128>}]} {
    %c1_i32 = arith.constant 1 : i32
    %0 = arith.muli %arg0, %c1_i32 : i32
    %1 = arith.addi %0, %arg1 : i32
    %c0_i32 = arith.constant 0 : i32
    %2 = arith.cmpi eq, %arg1, %c0_i32 : i32
    %3 = arith.extui %2 : i1 to i32
    %c0_i32_0 = arith.constant 0 : i32
    %4 = arith.cmpi ne, %3, %c0_i32_0 : i32
    scf.if %4 {
      %cst_16 = arith.constant 0.000000e+00 : f32
      %49 = vector.broadcast %cst_16 : f32 to vector<8x128xf32>
      %c0_17 = arith.constant 0 : index
      %c0_18 = arith.constant 0 : index
      %50 = vector.load %arg5[%c0_17, %c0_18] : memref<8x128xf32, #tpu.memory_space<vmem>>, vector<8x128xf32>
      tpu.vector_store %arg5[%c0_17, %c0_18], %49 {strides = array<i32>} : memref<8x128xf32, #tpu.memory_space<vmem>>, vector<8x128xf32>,
    } else {
    }
    %c0 = arith.constant 0 : index
    %c0_1 = arith.constant 0 : index
    %5 = vector.load %arg2[%c0, %c0_1] : memref<16x128xf32, #tpu.memory_space<vmem>>, vector<16x128xf32>
    %c0_2 = arith.constant 0 : index
    %c0_3 = arith.constant 0 : index
    %6 = vector.load %arg3[%c0_2, %c0_3] : memref<16x128xf32, #tpu.memory_space<vmem>>, vector<16x128xf32>
    %7 = math.absf %5 : vector<16x128xf32>
    %cst = arith.constant 0.000000e+00 : f32
    %8 = vector.broadcast %cst : f32 to vector<16x128xf32>
    %9 = arith.subf %8, %7 : vector<16x128xf32>
    %10 = math.exp %9 : vector<16x128xf32>
    %cst_4 = arith.constant 0.000000e+00 : f32
    %11 = vector.broadcast %cst_4 : f32 to vector<16x128xf32>
    %12 = arith.maximumf %5, %11 : vector<16x128xf32>
    %13 = arith.mulf %5, %6 : vector<16x128xf32>
    %14 = arith.subf %12, %13 : vector<16x128xf32>
    %15 = math.log1p %10 : vector<16x128xf32>
    %16 = arith.addf %14, %15 : vector<16x128xf32>
    %cst_5 = arith.constant 1.000000e+00 : f32
    %17 = vector.broadcast %cst_5 : f32 to vector<16x128xf32>
    %18 = arith.addf %17, %10 : vector<16x128xf32>
    %19 = tpu.reciprocal %18 {approx = true} : vector<16x128xf32> -> vector<16x128xf32>
    %20 = arith.mulf %18, %19 : vector<16x128xf32>
    %cst_6 = arith.constant 2.000000e+00 : f32
    %21 = vector.broadcast %cst_6 : f32 to vector<16x128xf32>
    %22 = arith.subf %21, %20 : vector<16x128xf32>
    %23 = arith.mulf %19, %22 : vector<16x128xf32>
    %cst_7 = arith.constant 0.000000e+00 : f32
    %24 = vector.broadcast %cst_7 : f32 to vector<16x128xf32>
    %25 = arith.cmpf oge, %5, %24 : vector<16x128xf32>
    %26 = arith.mulf %10, %23 : vector<16x128xf32>
    %27 = arith.select %25, %23, %26 : vector<16x128xi1>, vector<16x128xf32>
    %cst_8 = arith.constant -5.000000e-01 : f32
    %28 = vector.broadcast %cst_8 : f32 to vector<16x128xf32>
    %29 = arith.mulf %6, %28 : vector<16x128xf32>
    %cst_9 = arith.constant 7.500000e-01 : f32
    %30 = vector.broadcast %cst_9 : f32 to vector<16x128xf32>
    %31 = arith.addf %30, %29 : vector<16x128xf32>
    %32 = arith.subf %6, %27 : vector<16x128xf32>
    %33 = math.absf %32 : vector<16x128xf32>
    %34 = math.sqrt %33 : vector<16x128xf32>
    %35 = arith.mulf %33, %34 : vector<16x128xf32>
    %36 = arith.mulf %16, %31 : vector<16x128xf32>
    %37 = arith.mulf %36, %35 : vector<16x128xf32>
    %c2048_i32 = arith.constant 2048 : i32
    %38 = arith.muli %1, %c2048_i32 : i32
    %c2048_i32_10 = arith.constant 2048 : i32
    %39 = arith.addi %38, %c2048_i32_10 : i32
    %c2048_i32_11 = arith.constant 2048 : i32
    %40 = arith.cmpi sle, %39, %c2048_i32_11 : i32
    %41 = arith.extui %40 : i1 to i32
    %c0_i32_12 = arith.constant 0 : i32
    %42 = arith.cmpi ne, %41, %c0_i32_12 : i32
    scf.if %42 {
      %c0_16 = arith.constant 0 : index
      %c0_17 = arith.constant 0 : index
      %49 = vector.load %arg5[%c0_16, %c0_17] : memref<8x128xf32, #tpu.memory_space<vmem>>, vector<8x128xf32>
      %50 = vector.shape_cast %37 : vector<16x128xf32> to vector<2x8x128xf32>
      %cst_18 = arith.constant dense<0.000000e+00> : vector<8x128xf32>
      %51 = vector.multi_reduction <add>, %50, %cst_18 [0] : vector<2x8x128xf32> to vector<8x128xf32>
      %52 = arith.addf %49, %51 : vector<8x128xf32>
      %c0_19 = arith.constant 0 : index
      %c0_20 = arith.constant 0 : index
      %53 = vector.load %arg5[%c0_19, %c0_20] : memref<8x128xf32, #tpu.memory_space<vmem>>, vector<8x128xf32>
      tpu.vector_store %arg5[%c0_19, %c0_20], %52 {strides = array<i32>} : memref<8x128xf32, #tpu.memory_space<vmem>>, vector<8x128xf32>,
    } else {
    }
    %true = arith.constant true
    %43 = arith.xori %40, %true : i1
    %44 = arith.extui %43 : i1 to i32
    %c0_i32_13 = arith.constant 0 : i32
    %45 = arith.cmpi ne, %44, %c0_i32_13 : i32
    scf.if %45 {
      %49 = tpu.iota {dimensions = array<i32: 0>} : vector<16x128xi32>
      %50 = tpu.iota {dimensions = array<i32: 1>} : vector<16x128xi32>
      %c128_i32 = arith.constant 128 : i32
      %51 = vector.broadcast %c128_i32 : i32 to vector<16x128xi32>
      %52 = arith.muli %49, %51 : vector<16x128xi32>
      %53 = vector.broadcast %38 : i32 to vector<16x128xi32>
      %54 = arith.addi %53, %52 : vector<16x128xi32>
      %55 = arith.addi %54, %50 : vector<16x128xi32>
      %c2048_i32_16 = arith.constant 2048 : i32
      %56 = vector.broadcast %c2048_i32_16 : i32 to vector<16x128xi32>
      %57 = arith.cmpi slt, %55, %56 : vector<16x128xi32>
      %cst_17 = arith.constant 0.000000e+00 : f32
      %58 = vector.broadcast %cst_17 : f32 to vector<16x128xf32>
      %59 = arith.select %57, %37, %58 : vector<16x128xi1>, vector<16x128xf32>
      %c0_18 = arith.constant 0 : index
      %c0_19 = arith.constant 0 : index
      %60 = vector.load %arg5[%c0_18, %c0_19] : memref<8x128xf32, #tpu.memory_space<vmem>>, vector<8x128xf32>
      %61 = vector.shape_cast %59 : vector<16x128xf32> to vector<2x8x128xf32>
      %cst_20 = arith.constant dense<0.000000e+00> : vector<8x128xf32>
      %62 = vector.multi_reduction <add>, %61, %cst_20 [0] : vector<2x8x128xf32> to vector<8x128xf32>
      %63 = arith.addf %60, %62 : vector<8x128xf32>
      %c0_21 = arith.constant 0 : index
      %c0_22 = arith.constant 0 : index
      %64 = vector.load %arg5[%c0_21, %c0_22] : memref<8x128xf32, #tpu.memory_space<vmem>>, vector<8x128xf32>
      tpu.vector_store %arg5[%c0_21, %c0_22], %63 {strides = array<i32>} : memref<8x128xf32, #tpu.memory_space<vmem>>, vector<8x128xf32>,
    } else {
    }
    %c0_i32_14 = arith.constant 0 : i32
    %46 = arith.cmpi eq, %arg1, %c0_i32_14 : i32
    %47 = arith.extui %46 : i1 to i32
    %c0_i32_15 = arith.constant 0 : i32
    %48 = arith.cmpi ne, %47, %c0_i32_15 : i32
    scf.if %48 {
      %c0_16 = arith.constant 0 : index
      %c0_17 = arith.constant 0 : index
      %49 = vector.load %arg5[%c0_16, %c0_17] : memref<8x128xf32, #tpu.memory_space<vmem>>, vector<8x128xf32>
      %c0_18 = arith.constant 0 : index
      %c0_19 = arith.constant 0 : index
      %50 = vector.load %arg4[%c0_18, %c0_19] : memref<8x128xf32, #tpu.memory_space<vmem>>, vector<8x128xf32>
      tpu.vector_store %arg4[%c0_18, %c0_19], %49 {strides = array<i32>} : memref<8x128xf32, #tpu.memory_space<vmem>>, vector<8x128xf32>,
    } else {
    }
    return
  }
  func.func @transform_0(%arg0: i32, %arg1: i32) -> (i32, i32) {
    %c1_i32 = arith.constant 1 : i32
    %0 = arith.muli %arg0, %c1_i32 : i32
    %1 = arith.addi %0, %arg1 : i32
    %c0_i32 = arith.constant 0 : i32
    %2 = arith.minsi %1, %c0_i32 : i32
    %c0_i32_0 = arith.constant 0 : i32
    %c0_i32_1 = arith.constant 0 : i32
    return %2, %c0_i32_0 : i32, i32
  }
  func.func @transform_1(%arg0: i32, %arg1: i32) -> (i32, i32) {
    %c1_i32 = arith.constant 1 : i32
    %0 = arith.muli %arg0, %c1_i32 : i32
    %1 = arith.addi %0, %arg1 : i32
    %c0_i32 = arith.constant 0 : i32
    %2 = arith.minsi %1, %c0_i32 : i32
    %c0_i32_0 = arith.constant 0 : i32
    %c0_i32_1 = arith.constant 0 : i32
    return %2, %c0_i32_0 : i32, i32
  }
  func.func @transform_2(%arg0: i32, %arg1: i32) -> (i32, i32) {
    %c0_i32 = arith.constant 0 : i32
    %c0_i32_0 = arith.constant 0 : i32
    return %arg0, %c0_i32 : i32, i32
  }
}

</mosaic_0001>

<bundles_post_ra>
// kernel: tpu_custom_call.1
= control target key start
LH: loop header
LB: loop body
LE: loop exit
PB: predicated region body
PF: predicated region fallthrough
CT: control target
= control target key end

     0   :  { %7 = vsyncpa [#allocation4], 0  ;;  %s323_s0 = inlined_call_operand.hbm [shape: f32[16,128], index: 0, kind: input, shape index: {}]   ;;  %s324_s1 = inlined_call_operand.hbm [shape: f32[16,128], index: 1, kind: input, shape index: {}]   ;;  %s325_s2 = inlined_call_operand.hbm [shape: f32[8,128], index: 2, kind: output, shape index: {}]  }
   0x1   :  { %8 = vsyncpa [#allocation7], 0 }
   0x2   :  { %9 = vsyncpa [#allocation5], 0  ;;  %s294_s9 = smov [#allocation3]  }
   0x3   :  { %s21_s10 = sshll.u32 %s294_s9, 4  ;;  %s22_s10 = int_to_ptr.vmem [resolvable:$true] %s21_s10 }
   0x4   :  { %s236_s11 = scalar_lea.vmem %s22_s10, 256  ;;  %p241_p1 = scmp.lt.s32.totalorder %s22_s10, %s22_s10 }
   0x5   :  { %p237_p0 = scmp.ne.s32.totalorder %s22_s10, %s236_s11  ;;  %p242_p2 = scmp.lt.s32.totalorder %s236_s11, %s236_s11 }
   0x7   :  { %p243_p3 = por %p242_p2, %p241_p1 }
   0x9   :  { %p244_p4 = pnand %p243_p3, %p237_p0 }
   0xb   :  { %247 = shalt.err (!%p244_p4)
}
   0xc   :  { %s295_s12 = smov 128   ;;  %s296_s13 = smov 8  }
   0xd   :  { %27 = dma.hbm_to_vmem [thread:$0]  %s323_s0, 256, %s22_s10, [#allocation4], %s295_s12, %s295_s12, %s296_s13  }
   0xe   :  { %s297_s16 = smov [#allocation6]  }
   0xf   :  { %s39_s17 = sshll.u32 %s297_s16, 4  ;;  %s40_s17 = int_to_ptr.vmem [resolvable:$true] %s39_s17 }
  0x10   :  { %s256_s18 = scalar_lea.vmem %s40_s17, 256  ;;  %p261_p6 = scmp.lt.s32.totalorder %s40_s17, %s40_s17 }
  0x11   :  { %p257_p5 = scmp.ne.s32.totalorder %s40_s17, %s256_s18  ;;  %p262_p7 = scmp.lt.s32.totalorder %s256_s18, %s256_s18 }
  0x13   :  { %p263_p8 = por %p262_p7, %p261_p6 }
  0x15   :  { %p264_p9 = pnand %p263_p8, %p257_p5 }
  0x17   :  { %267 = shalt.err (!%p264_p9)
}
  0x18   :  { %45 = dma.hbm_to_vmem [thread:$0]  %s324_s1, 256, %s40_s17, [#allocation7], %s295_s12, %s295_s12, %s296_s13  }
  0x19   :  { %288 = dma.done.wait [#allocation4], 256  }
  0x1a   :  { %289 = vsyncadd [#allocation4], 4294967040 }
  0x1b   :  { %290 = dma.done.wait [#allocation7], 256  }
  0x1c   :  { %291 = vsyncadd [#allocation7], 4294967040  ;;  %v66_v0 = vld [vmem:[#allocation3] sm:$0xff]  ;;  %v67_v1 = vld [vmem:[#allocation3 + $0x8] sm:$0xff]  ;;  %s298_s0 = smov [#allocation8]  }
  0x1d   :  { %v70_v2 = vand.u32 2147483647, %v66_v0  ;;  %v71_v3 = vand.u32 2147483647, %v67_v1  ;;  %vm114_vm0 = vcmp.ge.f32.partialorder %v66_v0, 0.0  ;;  %v68_v20 = vld [vmem:[#allocation6] sm:$0xff] }
  0x1e   :  { %vm115_vm1 = vcmp.ge.f32.partialorder %v67_v1, 0.0  ;;  %v69_v22 = vld [vmem:[#allocation6 + $0x8] sm:$0xff]  ;;  %v78_v38 = vmax.f32 %v66_v0, 0.0  ;;  %v80_v39 = vmul.f32 %v68_v20, %v66_v0  ;;  %v79_v40 = vmax.f32 %v67_v1, 0.0  ;;  %s193_s1 = sshll.u32 %s298_s0, 4  ;;  %s194_s1 = int_to_ptr.vmem [resolvable:$true] %s193_s1 }
  0x1f   :  { %v72_v4 = vsub.f32 0.0, %v70_v2  ;;  %v73_v5 = vsub.f32 0.0, %v71_v3  ;;  %v81_v41 = vmul.f32 %v69_v22, %v67_v1  ;;  %v120_v47 = vmul.f32 -0.5, %v68_v20  ;;  %s268_s21 = scalar_lea.vmem %s194_s1, 128  ;;  %p273_p11 = scmp.lt.s32.totalorder %s194_s1, %s194_s1 }
  0x20   :  { %v82_v46 = vsub.f32 %v78_v38, %v80_v39  ;;  %v121_v50 = vmul.f32 -0.5, %v69_v22  ;;  %p269_p10 = scmp.ne.s32.totalorder %s194_s1, %s268_s21  ;;  %p274_p12 = scmp.lt.s32.totalorder %s268_s21, %s268_s21 }
  0x21   :  { %v74_v6 = vmul.f32 1.442695, %v72_v4  ;;  %v76_v7 = vmul.f32 1.442695, %v73_v5  ;;  %v83_v48 = vsub.f32 %v79_v40, %v81_v41  ;;  %v122_v53 = vadd.f32 0.75, %v120_v47 }
  0x22   :  { %v123_v56 = vadd.f32 0.75, %v121_v50  ;;  %p275_p13 = por %p274_p12, %p273_p11 }
  0x23   :  { %212 = vpow2.f32 %v74_v6 }
  0x24   :  { %214 = vpow2.f32 %v76_v7  ;;  %p276_p0 = pnand %p275_p13, %p269_p10 }
  0x30   :  { %v213_v8 = vpop.eup %212 }
  0x31   :  { %v215_v9 = vpop.eup %214  ;;  %v84_v10 = vadd.f32 1.0, %v213_v8  ;;  %v87_v27 = vmul.f32 -0.5, %v213_v8  ;;  %v90_v34 = vand.u32 2147483647, %v213_v8 }
  0x32   :  { %v93_v11 = vadd.f32 1.0, %v215_v9  ;;  %v96_v29 = vmul.f32 -0.5, %v215_v9  ;;  %v99_v37 = vand.u32 2147483647, %v215_v9 }
  0x33   :  { %216 = vrcp.f32 %v84_v10  ;;  %v88_v32 = vadd.f32 1.0, %v87_v27  ;;  %vm91_vm2 = vcmp.lt.f32.partialorder %v90_v34, 0.0004427343 }
  0x34   :  { %218 = vrcp.f32 %v93_v11  ;;  %v97_v35 = vadd.f32 1.0, %v96_v29  ;;  %vm100_vm3 = vcmp.lt.f32.partialorder %v99_v37, 0.0004427343 }
  0x35   :  { %220 = vlog2.f32 %v84_v10  ;;  %v89_v43 = vmul.f32 %v213_v8, %v88_v32 }
  0x36   :  { %222 = vlog2.f32 %v93_v11  ;;  %v98_v45 = vmul.f32 %v215_v9, %v97_v35 }
  0x40   :  { %v217_v12 = vpop.eup %216 }
  0x41   :  { %v219_v13 = vpop.eup %218  ;;  %v108_v14 = vmul.f32 %v217_v12, %v84_v10 }
  0x42   :  { %v109_v15 = vmul.f32 %v219_v13, %v93_v11  ;;  %v221_v33 = vpop.eup %220 }
  0x43   :  { %v110_v16 = vsub.f32 2.0, %v108_v14  ;;  %v223_v36 = vpop.eup %222  ;;  %v86_v42 = vmul.f32 0.6931472, %v221_v33 }
  0x44   :  { %v111_v17 = vsub.f32 2.0, %v109_v15  ;;  %v95_v44 = vmul.f32 0.6931472, %v223_v36 }
  0x45   :  { %v112_v18 = vmul.f32 %v217_v12, %v110_v16  ;;  %v92_v49 = vsel %vm91_vm2, %v89_v43, %v86_v42 }
  0x46   :  { %v113_v19 = vmul.f32 %v219_v13, %v111_v17  ;;  %v101_v51 = vsel %vm100_vm3, %v98_v45, %v95_v44  ;;  %v102_v52 = vadd.f32 %v92_v49, %v82_v46 }
  0x47   :  { %v116_v21 = vmul.f32 %v213_v8, %v112_v18  ;;  %v103_v55 = vadd.f32 %v101_v51, %v83_v48 }
  0x48   :  { %v117_v23 = vmul.f32 %v215_v9, %v113_v19  ;;  %v144_v63 = vmul.f32 %v122_v53, %v102_v52 }
  0x49   :  { %v118_v24 = vsel %vm114_vm0, %v112_v18, %v116_v21  ;;  %v145_v2 = vmul.f32 %v123_v56, %v103_v55 }
  0x4a   :  { %v119_v25 = vsel %vm115_vm1, %v113_v19, %v117_v23  ;;  %v124_v26 = vsub.f32 %v68_v20, %v118_v24 }
  0x4b   :  { %v125_v28 = vsub.f32 %v69_v22, %v119_v25 }
  0x4c   :  { %v126_v30 = vand.u32 2147483647, %v124_v26 }
  0x4d   :  { %v127_v31 = vand.u32 2147483647, %v125_v28 }
  0x4e   :  { %224 = vrsqrt.f32 %v126_v30  ;;  %vm130_vm4 = vcmp.eq.f32.partialorder %v126_v30, inf  ;;  %v133_v57 = vand.u32 2147483648, %v126_v30  ;;  %vm132_vm5 = vcmp.eq.f32.partialorder %v126_v30, 0.0 }
  0x4f   :  { %226 = vrsqrt.f32 %v127_v31  ;;  %vm137_vm6 = vcmp.eq.f32.partialorder %v127_v31, inf  ;;  %v140_v60 = vand.u32 2147483648, %v127_v31  ;;  %vm139_vm7 = vcmp.eq.f32.partialorder %v127_v31, 0.0 }
  0x5b   :  { %v225_v54 = vpop.eup %224 }
  0x5c   :  { %v227_v58 = vpop.eup %226  ;;  %v129_v59 = vmul.f32 %v225_v54, %v126_v30 }
  0x5d   :  { %v136_v61 = vmul.f32 %v227_v58, %v127_v31 }
  0x5e   :  { %v131_v62 = vsel %vm130_vm4, %v126_v30, %v129_v59 }
  0x5f   :  { %v134_v0 = vsel %vm132_vm5, %v133_v57, %v131_v62  ;;  %v138_v1 = vsel %vm137_vm6, %v127_v31, %v136_v61 }
  0x60   :  { %v141_v3 = vsel %vm139_vm7, %v140_v60, %v138_v1  ;;  %v142_v4 = vmul.f32 %v134_v0, %v126_v30 }
  0x61   :  { %v143_v5 = vmul.f32 %v141_v3, %v127_v31 }
  0x62   :  { %v146_v6 = vmul.f32 %v144_v63, %v142_v4 }
  0x63   :  { %v147_v7 = vmul.f32 %v145_v2, %v143_v5 }
  0x65   :  { %v155_v8 = vadd.f32 %v147_v7, %v146_v6 }
  0x67   :  { %186 = vst [vmem:[#allocation8] sm:$0xff] %v155_v8 }
  0x68   :  { %279 = shalt.err (!%p276_p0)
}
  0x69   :  { %196 = dma.vmem_to_hbm [thread:$0]  %s194_s1, 128, %s325_s2, [#allocation5]  }
  0x6a   :  { %292 = dma.done.wait [#allocation5], 128  }
  0x6b   :  { %293 = vsyncadd [#allocation5], 4294967168 }
  0x6c   :  { %200 = vsyncpa [#allocation4], 1 }
  0x6d   :  { %201 = vsyncpa [#allocation7], 1 }
  0x6e   :  { %202 = vsyncpa [#allocation5], 1 }

</bundles_post_ra>
